<compile_context>
chip_gen: v7x
topology: tpu7x:2x2x1
jax: 0.10.0
libtpu: 0.0.40
codegen_flags: <defaults>
</compile_context>

<pallas_src>
import functools
import math

import jax
import jax.numpy as jnp
from jax import lax
from jax.experimental import pallas as pl
from jax.experimental.pallas import tpu as pltpu


def _mlp_kernel(num_layers, *refs):
    """One batch tile of the fused MLP.

    refs = (x_ref, w0, b0, w1, b1, ..., w_{L-1}, b_{L-1}, o_ref)
      x_ref : (batch_tile, in0)        -- native PyTorch layout (batch on sublanes)
      w_k   : (out_k, in_k)            -- PyTorch nn.Linear layout
      b_k   : (out_k, 1)
      o_ref : (out_last, batch_tile)   -- transposed: batch on lanes (lane-dense store)
    """
    x_ref = refs[0]
    o_ref = refs[-1]
    params = refs[1:-1]

    w0 = params[0][...]
    b0 = params[1][...].astype(jnp.float32)
    x = x_ref[...].astype(w0.dtype)
    # First layer contracts in_dim of BOTH operands (== w0 @ x.T): no wrapper transpose
    # needed; result is (out0, batch_tile) with the batch on lanes. f32 accumulation.
    h = lax.dot_general(
        w0, x,
        dimension_numbers=(((1,), (1,)), ((), ())),
        preferred_element_type=jnp.float32,
    ) + b0
    if num_layers > 1:
        h = jnp.tanh(h)  # EUP on full-width vregs

    for i in range(1, num_layers):
        w = params[2 * i][...]
        b = params[2 * i + 1][...].astype(jnp.float32)
        h = jnp.dot(w, h.astype(w.dtype), preferred_element_type=jnp.float32) + b
        if i != num_layers - 1:
            h = jnp.tanh(h)

    o_ref[...] = h.astype(o_ref.dtype)


def _round_up(a, m):
    return ((a + m - 1) // m) * m


def _vmem_capacity_bytes():
    try:
        cap = getattr(pltpu.get_tpu_info(), "vmem_capacity_bytes", None)
        if cap:
            return int(cap)
    except Exception:
        pass
    return 64 << 20  # conservative fallback (v7x per-TensorCore VMEM)


def mlp_forward(x, weights, biases, *, batch_tile=512, param_dtype=None):
    """Fused MLP forward: alternating Linear / Tanh, no activation on the final layer.

    x:          (B, layers[0]) float32 (native PyTorch layout, not transposed)
    weights:    list of (out_k, in_k) arrays  (PyTorch nn.Linear layout)
    biases:     list of (out_k,) arrays
    batch_tile: batch rows per grid step, rounded to a multiple of 128 (vreg lanes) and
                capped at 1024.  Small batches collapse to a single grid step.
    param_dtype: optional reduced precision for weights (e.g. jnp.bfloat16); matmuls still
                 accumulate in f32 and bias/tanh stay in f32.
    """
    num_layers = len(weights)
    B, in_dim = x.shape
    out_dim = weights[-1].shape[0]

    lane = 128
    bt = max(lane, (int(batch_tile) // lane) * lane)
    bt = min(bt, 1024)               # live h is (width, bt) f32 -> keep it spill-free
    b_up = _round_up(B, lane)
    if b_up <= bt:
        bt = b_up                    # small batch: single grid step, no per-step overhead
    grid = (pl.cdiv(B, bt),)
    # v7x note: for large B the default bt=512 gives each TensorCore (>=2) steps on the
    # 'parallel' batch axis, so the auto-pipeline still has work to overlap per core.

    if param_dtype is not None:
        weights = [w.astype(param_dtype) for w in weights]
    biases2d = [b.astype(jnp.float32).reshape(-1, 1) for b in biases]   # (out_k, 1)

    kernel = functools.partial(_mlp_kernel, num_layers)

    # x / out tiles walk the batch; weights & biases are grid-invariant (index_map == (0,0)).
    # If the weights ever grow past toy size, add pipeline_mode=pl.Buffered(1) to the param
    # specs (grid-invariant blocks don't need double-buffering); at ~5 KB it is negligible.
    in_specs = [pl.BlockSpec((bt, in_dim), lambda i: (i, 0))]
    flat_params = []
    for w, b in zip(weights, biases2d):
        in_specs.append(pl.BlockSpec(w.shape, lambda i: (0, 0)))
        in_specs.append(pl.BlockSpec(b.shape, lambda i: (0, 0)))
        flat_params.extend([w, b])
    out_specs = pl.BlockSpec((out_dim, bt), lambda i: (0, i))

    # Advisory cost for XLA's scheduler around the fused custom call.
    flops = 2 * B * sum(int(w.shape[0]) * int(w.shape[1]) for w in weights)
    transcendentals = B * sum(int(w.shape[0]) for w in weights[:-1])
    bytes_accessed = (
        int(x.size) * x.dtype.itemsize
        + sum(int(a.size) * a.dtype.itemsize for a in flat_params)
        + B * out_dim * x.dtype.itemsize
    )
    cost = pl.CostEstimate(
        flops=flops, transcendentals=transcendentals, bytes_accessed=bytes_accessed
    )

    # VMEM budget: double-buffered x/out tiles + params + live intermediates + headroom,
    # clamped to ~75% of this chip's VMEM (~48 MiB on v7x, ~96 MiB on v5e/v6e).
    max_width = max(int(w.shape[0]) for w in weights)
    tile_bytes = (in_dim + out_dim) * bt * 4
    h_bytes = 2 * max_width * bt * 4
    param_bytes = sum(int(a.size) * a.dtype.itemsize for a in flat_params)
    vmem_limit = min(
        max(4 * tile_bytes + 2 * param_bytes + h_bytes + (4 << 20), 8 << 20),
        (_vmem_capacity_bytes() * 3) // 4,
    )

    out_t = pl.pallas_call(
        kernel,
        out_shape=jax.ShapeDtypeStruct((out_dim, B), x.dtype),
        grid_spec=pltpu.PrefetchScalarGridSpec(
            num_scalar_prefetch=0,
            grid=grid,
            in_specs=in_specs,
            out_specs=out_specs,
        ),
        compiler_params=pltpu.CompilerParams(
            dimension_semantics=("parallel",),
            vmem_limit_bytes=vmem_limit,
        ),
        cost_estimate=cost,
    )(x, *flat_params)

    # Kernel output is (out_dim, B) with batch on lanes; back to PyTorch (B, out_dim).
    # For this config out_dim == 1, so this is effectively a free reshape.
    return jnp.transpose(out_t)


def init_mlp_params(key, layers):
    """nn.Linear default init: U(-1/sqrt(fan_in), 1/sqrt(fan_in)), PyTorch (out, in) layout."""
    weights, biases = [], []
    for i in range(len(layers) - 1):
        fan_in, fan_out = layers[i], layers[i + 1]
        key, kw, kb = jax.random.split(key, 3)
        bound = 1.0 / math.sqrt(fan_in)
        w = jax.random.uniform(kw, (fan_out, fan_in), jnp.float32, -bound, bound)
        b = jax.random.uniform(kb, (fan_out,), jnp.float32, -bound, bound)
        weights.append(w)
        biases.append(b)
    return weights, biases


def mlp_reference(x, weights, biases):
    h = x
    for i, (w, b) in enumerate(zip(weights, biases)):
        h = jnp.dot(h, w.T, precision=jax.lax.Precision.HIGHEST) + b
        if i != len(weights) - 1:
            h = jnp.tanh(h)
    return h


if __name__ == "__main__":
    # MLP(layers=[4, 32, 32, 1]) as in TwoBody_AC.py.  B=200 is not a lane multiple
    # (exercises the ragged last block) and collapses to a single grid step.
    layers = [4, 32, 32, 1]
    batch = 200

    key = jax.random.PRNGKey(0)
    key, kx = jax.random.split(key)
    x = jax.random.normal(kx, (batch, layers[0]), jnp.float32)
    weights, biases = init_mlp_params(key, layers)

    out = mlp_forward(x, weights, biases)          # defaults: batch_tile=512 -> single step
    out = jax.block_until_ready(out)

    ref = mlp_reference(x, weights, biases)
    assert out.shape == (batch, layers[-1])
    # Default-precision MXU matmuls (single bf16 pass) vs. HIGHEST-precision reference:
    # expected |err| ~1e-3 at these widths, so 2e-2 is a comfortable bound.
    assert jnp.allclose(out, ref, atol=2e-2, rtol=2e-2), "mismatch vs pure-JAX reference"

    print("KERNEL_OK")
</pallas_src>

<mosaic_0001>
module attributes {stable_mosaic.version = 11 : i64} {
  func.func @_mlp_kernel(%arg0: i32, %arg1: memref<256x4xf32, #tpu.memory_space<vmem>>, %arg2: memref<32x4xf32, #tpu.memory_space<vmem>>, %arg3: memref<32x1xf32, #tpu.memory_space<vmem>>, %arg4: memref<32x32xf32, #tpu.memory_space<vmem>>, %arg5: memref<32x1xf32, #tpu.memory_space<vmem>>, %arg6: memref<1x32xf32, #tpu.memory_space<vmem>>, %arg7: memref<1x1xf32, #tpu.memory_space<vmem>>, %arg8: memref<1x256xf32, #tpu.memory_space<vmem>>) attributes {dimension_semantics = [#tpu.dimension_semantics<parallel>], iteration_bounds = array<i64: 1>, scalar_prefetch = 0 : i64, scratch_operands = 0 : i64, tpu.core_type = #tpu.core_type<tc>, window_params = [{transform_indices = @transform_0, window_bounds = array<i64: 256, 4>}, {pipeline_mode = #tpu.pipeline_mode<synchronous>, transform_indices = @transform_1, window_bounds = array<i64: 32, 4>}, {pipeline_mode = #tpu.pipeline_mode<synchronous>, transform_indices = @transform_2, window_bounds = array<i64: 32, 1>}, {pipeline_mode = #tpu.pipeline_mode<synchronous>, transform_indices = @transform_3, window_bounds = array<i64: 32, 32>}, {pipeline_mode = #tpu.pipeline_mode<synchronous>, transform_indices = @transform_4, window_bounds = array<i64: 32, 1>}, {pipeline_mode = #tpu.pipeline_mode<synchronous>, transform_indices = @transform_5, window_bounds = array<i64: 1, 32>}, {pipeline_mode = #tpu.pipeline_mode<synchronous>, transform_indices = @transform_6, window_bounds = array<i64: 1, 1>}, {transform_indices = @transform_7, window_bounds = array<i64: 1, 256>}]} {
    %c0 = arith.constant 0 : index
    %c0_0 = arith.constant 0 : index
    %0 = vector.load %arg2[%c0, %c0_0] : memref<32x4xf32, #tpu.memory_space<vmem>>, vector<32x4xf32>
    %c0_1 = arith.constant 0 : index
    %c0_2 = arith.constant 0 : index
    %1 = vector.load %arg3[%c0_1, %c0_2] : memref<32x1xf32, #tpu.memory_space<vmem>>, vector<32x1xf32>
    %c0_3 = arith.constant 0 : index
    %c0_4 = arith.constant 0 : index
    %2 = vector.load %arg1[%c0_3, %c0_4] : memref<256x4xf32, #tpu.memory_space<vmem>>, vector<256x4xf32>
    %cst = arith.constant dense<0.000000e+00> : vector<32x256xf32>
    %3 = tpu.matmul %0, %2, %cst {dimension_numbers = #tpu.dot_dimension_numbers<[1], [1], [0], [0], [0, 0, 1, 0], [], []>} : vector<32x4xf32>, vector<256x4xf32>, vector<32x256xf32> -> vector<32x256xf32>
    %4 = vector.broadcast %1 : vector<32x1xf32> to vector<32x256xf32>
    %5 = arith.addf %3, %4 : vector<32x256xf32>
    %6 = math.tanh %5 : vector<32x256xf32>
    %c0_5 = arith.constant 0 : index
    %c0_6 = arith.constant 0 : index
    %7 = vector.load %arg4[%c0_5, %c0_6] : memref<32x32xf32, #tpu.memory_space<vmem>>, vector<32x32xf32>
    %c0_7 = arith.constant 0 : index
    %c0_8 = arith.constant 0 : index
    %8 = vector.load %arg5[%c0_7, %c0_8] : memref<32x1xf32, #tpu.memory_space<vmem>>, vector<32x1xf32>
    %cst_9 = arith.constant dense<0.000000e+00> : vector<32x256xf32>
    %9 = tpu.matmul %7, %6, %cst_9 {dimension_numbers = #tpu.dot_dimension_numbers<[1], [0], [0], [1], [0, 0, 1, 1], [], []>} : vector<32x32xf32>, vector<32x256xf32>, vector<32x256xf32> -> vector<32x256xf32>
    %10 = vector.broadcast %8 : vector<32x1xf32> to vector<32x256xf32>
    %11 = arith.addf %9, %10 : vector<32x256xf32>
    %12 = math.tanh %11 : vector<32x256xf32>
    %c0_10 = arith.constant 0 : index
    %c0_11 = arith.constant 0 : index
    %13 = vector.load %arg6[%c0_10, %c0_11] : memref<1x32xf32, #tpu.memory_space<vmem>>, vector<1x32xf32>
    %c0_12 = arith.constant 0 : index
    %c0_13 = arith.constant 0 : index
    %14 = vector.load %arg7[%c0_12, %c0_13] : memref<1x1xf32, #tpu.memory_space<vmem>>, vector<1x1xf32>
    %cst_14 = arith.constant dense<0.000000e+00> : vector<1x256xf32>
    %15 = tpu.matmul %13, %12, %cst_14 {dimension_numbers = #tpu.dot_dimension_numbers<[1], [0], [0], [1], [0, 0, 1, 1], [], []>} : vector<1x32xf32>, vector<32x256xf32>, vector<1x256xf32> -> vector<1x256xf32>
    %16 = vector.broadcast %14 : vector<1x1xf32> to vector<1x256xf32>
    %17 = arith.addf %15, %16 : vector<1x256xf32>
    %c0_15 = arith.constant 0 : index
    %c0_16 = arith.constant 0 : index
    %18 = vector.load %arg8[%c0_15, %c0_16] : memref<1x256xf32, #tpu.memory_space<vmem>>, vector<1x256xf32>
    tpu.vector_store %arg8[%c0_15, %c0_16], %17 {strides = array<i32>} : memref<1x256xf32, #tpu.memory_space<vmem>>, vector<1x256xf32>,
    return
  }
  func.func @transform_0(%arg0: i32) -> (i32, i32) {
    %c0_i32 = arith.constant 0 : i32
    %c0_i32_0 = arith.constant 0 : i32
    return %arg0, %c0_i32 : i32, i32
  }
  func.func @transform_1(%arg0: i32) -> (i32, i32) {
    %c0_i32 = arith.constant 0 : i32
    %c0_i32_0 = arith.constant 0 : i32
    %c0_i32_1 = arith.constant 0 : i32
    return %c0_i32, %c0_i32_0 : i32, i32
  }
  func.func @transform_2(%arg0: i32) -> (i32, i32) {
    %c0_i32 = arith.constant 0 : i32
    %c0_i32_0 = arith.constant 0 : i32
    %c0_i32_1 = arith.constant 0 : i32
    return %c0_i32, %c0_i32_0 : i32, i32
  }
  func.func @transform_3(%arg0: i32) -> (i32, i32) {
    %c0_i32 = arith.constant 0 : i32
    %c0_i32_0 = arith.constant 0 : i32
    %c0_i32_1 = arith.constant 0 : i32
    return %c0_i32, %c0_i32_0 : i32, i32
  }
  func.func @transform_4(%arg0: i32) -> (i32, i32) {
    %c0_i32 = arith.constant 0 : i32
    %c0_i32_0 = arith.constant 0 : i32
    %c0_i32_1 = arith.constant 0 : i32
    return %c0_i32, %c0_i32_0 : i32, i32
  }
  func.func @transform_5(%arg0: i32) -> (i32, i32) {
    %c0_i32 = arith.constant 0 : i32
    %c0_i32_0 = arith.constant 0 : i32
    %c0_i32_1 = arith.constant 0 : i32
    return %c0_i32, %c0_i32_0 : i32, i32
  }
  func.func @transform_6(%arg0: i32) -> (i32, i32) {
    %c0_i32 = arith.constant 0 : i32
    %c0_i32_0 = arith.constant 0 : i32
    %c0_i32_1 = arith.constant 0 : i32
    return %c0_i32, %c0_i32_0 : i32, i32
  }
  func.func @transform_7(%arg0: i32) -> (i32, i32) {
    %c0_i32 = arith.constant 0 : i32
    %c0_i32_0 = arith.constant 0 : i32
    return %c0_i32, %arg0 : i32, i32
  }
}

</mosaic_0001>

<bundles_post_ra>
// kernel: tpu_custom_call.1
= control target key start
LH: loop header
LB: loop body
LE: loop exit
PB: predicated region body
PF: predicated region fallthrough
CT: control target
= control target key end

     0   :  { %s1023_s0 = inlined_call_operand.vmem [shape: f32[200,4], index: 0, kind: input, shape index: {}]   ;;  %s1024_s1 = inlined_call_operand.vmem [shape: f32[32,4], index: 1, kind: input, shape index: {}]   ;;  %s1025_s2 = inlined_call_operand.vmem [shape: f32[32,1], index: 2, kind: input, shape index: {}]   ;;  %s1026_s3 = inlined_call_operand.vmem [shape: f32[32,32], index: 3, kind: input, shape index: {}]   ;;  %s1027_s4 = inlined_call_operand.vmem [shape: f32[32,1], index: 4, kind: input, shape index: {}]   ;;  %s1028_s5 = inlined_call_operand.vmem [shape: f32[1,32], index: 5, kind: input, shape index: {}]   ;;  %s1029_s6 = inlined_call_operand.<no memory space> [shape: f32[1,1], index: 6, kind: input, shape index: {}]   ;;  %s1030_s7 = inlined_call_operand.hbm [shape: f32[1,200], index: 7, kind: output, shape index: {}]  }
   0x1   :  { %v12_v0 = vstv %s1029_s6 }
   0x2   :  { %13 = vst [vmem:[#allocation2] sm:$0x1] %v12_v0 }
   0x3   :  { %v53_v1 = vld [vmem:[%s1023_s0 + $0x80] sm:$0xff]  ;;  %v54_v2 = vld [vmem:[%s1023_s0 + $0x88] sm:$0xff]  ;;  %vm89_vm0 = vcmask 31744   ;;  %v55_v7 = vld [vmem:[%s1023_s0 + $0x90] sm:$0xff]  ;;  %v762_v8 = vmov 0  }
   0x4   :  { %v37_v3 = vld [vmem:[%s1023_s0] sm:$0xff]  ;;  %v636_v4 = vpack.c.bf16 %v54_v2, %v53_v1  ;;  %vm820_vm1 = vmpackc.low %vm89_vm0, %vm89_vm0  ;;  %v38_v6 = vld [vmem:[%s1023_s0 + $0x8] sm:$0xff]  ;;  %704 = vset.pattern.permute.xlu0 %v762_v8  ;;  %705 = vset.pattern.permute.xlu1 %v762_v8 }
   0x5   :  { %v639_v9 = vpack.c.bf16 %v38_v6, %v37_v3  ;;  %v56_v10 = vld [vmem:[%s1023_s0 + $0x98] sm:$0xff]  ;;  %v39_v12 = vld [vmem:[%s1023_s0 + $0x10] sm:$0xff]  ;;  %v57_v14 = vld [vmem:[%s1023_s0 + $0xa0] sm:$0xff] }
   0x6   :  { %638 = vmatprep.subr.msk.bf16.mxu0 %vm820_vm1, %v636_v4  ;;  %v642_v11 = vpack.c.bf16 %v56_v10, %v55_v7  ;;  %v40_v13 = vld [vmem:[%s1023_s0 + $0x18] sm:$0xff]  ;;  %v58_v15 = vld [vmem:[%s1023_s0 + $0xa8] sm:$0xff]  ;;  %v854_v18 = vld [vmem:[%s1024_s1] sm:$0xff] }
   0x7   :  { %641 = vmatpush3.bf16.xpose.msk.msra.mxu0 %vm820_vm1, %v639_v9  ;;  %v645_v16 = vpack.c.bf16 %v40_v13, %v39_v12  ;;  %v648_v17 = vpack.c.bf16 %v58_v15, %v57_v14  ;;  %628 = vmatprep.mubr.msk.f32.mxu0 %vm89_vm0, %v854_v18  ;;  %v33_v19 = vld [vmem:[%s1025_s2] sm:$0xff]  ;;  %v42_v21 = vld [vmem:[%s1023_s0 + $0x28] sm:$0xff]  ;;  %v35_v22 = vld [vmem:[%s1025_s2 + $0x10] sm:$0xff] }
   0x8   :  { %644 = vmatprep.subr.msk.bf16.mxu0 %vm820_vm1, %v642_v11  ;;  %v41_v20 = vld [vmem:[%s1023_s0 + $0x20] sm:$0xff]  ;;  %71 = vperm.xlu0 %704, %v33_v19   ;;  %v59_v23 = vld [vmem:[%s1023_s0 + $0xb0] sm:$0xff]  ;;  %v60_v24 = vld [vmem:[%s1023_s0 + $0xb8] sm:$0xff] }
   0x9   :  { %v34_v25 = vld [vmem:[%s1025_s2 + $0x8] sm:$0xff]  ;;  %81 = vperm.xlu1 %705, %v35_v22   ;;  %v36_v26 = vld [vmem:[%s1025_s2 + $0x18] sm:$0xff] }
   0xf   :  { %647 = vmatpush3.bf16.xpose.msk.msra.mxu0 %vm820_vm1, %v645_v16 }
  0x10   :  { %650 = vmatprep.subr.msk.bf16.mxu0 %vm820_vm1, %v648_v17 }
  0x11   :  { %14 = vsyncpa [#allocation4], 0  ;;  %v651_v27 = vpack.c.bf16 %v42_v21, %v41_v20  ;;  %v654_v28 = vpack.c.bf16 %v60_v24, %v59_v23  ;;  %76 = vperm.xlu0 %704, %v34_v25   ;;  %v299_v29 = vld [vmem:[%s1027_s4] sm:$0xff]  ;;  %86 = vperm.xlu1 %705, %v36_v26   ;;  %v300_v30 = vld [vmem:[%s1027_s4 + $0x8] sm:$0xff]  ;;  %v763_v0 = vmov 0.0   ;;  %vm323_vm2 = vcmask 261120  }
  0x12   :  { %v43_v31 = vld [vmem:[%s1023_s0 + $0x30] sm:$0xff]  ;;  %v44_v32 = vld [vmem:[%s1023_s0 + $0x38] sm:$0xff]  ;;  %v61_v33 = vld [vmem:[%s1023_s0 + $0xc0] sm:$0xff]  ;;  %400 = vmatprep.mubr.f32.mxu1 %v763_v0  ;;  %s765_s20 = smov [#allocation3]  }
  0x13   :  { %v62_v34 = vld [vmem:[%s1023_s0 + $0xc8] sm:$0xff]  ;;  %v301_v35 = vld [vmem:[%s1027_s4 + $0x10] sm:$0xff]  ;;  %v302_v36 = vld [vmem:[%s1027_s4 + $0x18] sm:$0xff]  ;;  %v657_v37 = vpack.c.bf16 %v44_v32, %v43_v31  ;;  %s547_s21 = sshll.u32 %s765_s20, 4  ;;  %s548_s21 = int_to_ptr.vmem [resolvable:$true] %s547_s21 }
  0x14   :  { %v660_v38 = vpack.c.bf16 %v62_v34, %v61_v33  ;;  %v434_v39 = vld [vmem:[#allocation2] sm:$0x1]  ;;  %v46_v41 = vld [vmem:[%s1023_s0 + $0x48] sm:$0xff]  ;;  %v63_v42 = vld [vmem:[%s1023_s0 + $0xd0] sm:$0xff]  ;;  %p743_p1 = scmp.lt.s32.totalorder %s548_s21, %s548_s21 }
  0x15   :  { %305 = vperm.xlu0 %704, %v299_v29   ;;  %310 = vperm.xlu1 %705, %v300_v30   ;;  %v45_v40 = vld [vmem:[%s1023_s0 + $0x40] sm:$0xff]  ;;  %v64_v43 = vld [vmem:[%s1023_s0 + $0xd8] sm:$0xff]  ;;  %v47_v46 = vld [vmem:[%s1023_s0 + $0x50] sm:$0xff] }
  0x16   :  { %v663_v44 = vpack.c.bf16 %v46_v41, %v45_v40  ;;  %v666_v45 = vpack.c.bf16 %v64_v43, %v63_v42  ;;  %v48_v47 = vld [vmem:[%s1023_s0 + $0x58] sm:$0xff]  ;;  %v65_v48 = vld [vmem:[%s1023_s0 + $0xe0] sm:$0xff]  ;;  %v66_v49 = vld [vmem:[%s1023_s0 + $0xe8] sm:$0xff] }
  0x17   :  { %653 = vmatpush3.bf16.xpose.msk.msra.mxu0 %vm820_vm1, %v651_v27  ;;  %v669_v50 = vpack.c.bf16 %v48_v47, %v47_v46  ;;  %v672_v51 = vpack.c.bf16 %v66_v49, %v65_v48  ;;  %v49_v52 = vld [vmem:[%s1023_s0 + $0x60] sm:$0xff]  ;;  %v50_v53 = vld [vmem:[%s1023_s0 + $0x68] sm:$0xff]  ;;  %v67_v54 = vld [vmem:[%s1023_s0 + $0xf0] sm:$0xff] }
  0x18   :  { %656 = vmatprep.subr.msk.bf16.mxu0 %vm820_vm1, %v654_v28  ;;  %v68_v55 = vld [vmem:[%s1023_s0 + $0xf8] sm:$0xff]  ;;  %v675_v56 = vpack.c.bf16 %v50_v53, %v49_v52  ;;  %v51_v58 = vld [vmem:[%s1023_s0 + $0x70] sm:$0xff]  ;;  %v30_v61 = vld [vmem:[%s1024_s1 + $0x8] sm:$0xff] }
  0x19   :  { %315 = vperm.xlu0 %704, %v301_v35   ;;  %320 = vperm.xlu1 %705, %v302_v36   ;;  %v678_v57 = vpack.c.bf16 %v68_v55, %v67_v54  ;;  %v52_v59 = vld [vmem:[%s1023_s0 + $0x78] sm:$0xff]  ;;  %v31_v62 = vld [vmem:[%s1024_s1 + $0x10] sm:$0xff]  ;;  %v295_v33 = vld [vmem:[%s1026_s3] sm:$0xff] }
  0x1a   :  { %v681_v60 = vpack.c.bf16 %v52_v59, %v51_v58  ;;  %v32_v63 = vld [vmem:[%s1024_s1 + $0x18] sm:$0xff]  ;;  %v296_v34 = vld [vmem:[%s1026_s3 + $0x8] sm:$0xff]  ;;  %v297_v35 = vld [vmem:[%s1026_s3 + $0x10] sm:$0xff] }
  0x1b   :  { %v298_v36 = vld [vmem:[%s1026_s3 + $0x18] sm:$0xff] }
  0x1d   :  { %437 = vperm.xlu0 %704, %v434_v39  }
  0x1f   :  { %659 = vmatpush3.bf16.xpose.msk.msra.mxu0 %vm820_vm1, %v657_v37 }
  0x20   :  { %662 = vmatprep.subr.msk.bf16.mxu0 %vm820_vm1, %v660_v38 }
  0x27   :  { %665 = vmatpush3.bf16.xpose.msk.msra.mxu0 %vm820_vm1, %v663_v44 }
  0x28   :  { %668 = vmatprep.subr.msk.bf16.mxu0 %vm820_vm1, %v666_v45 }
  0x2f   :  { %671 = vmatpush3.bf16.xpose.msk.msra.mxu0 %vm820_vm1, %v669_v50 }
  0x30   :  { %674 = vmatprep.subr.msk.bf16.mxu0 %vm820_vm1, %v672_v51 }
  0x37   :  { %677 = vmatpush3.bf16.xpose.msk.msra.mxu0 %vm820_vm1, %v675_v56 }
  0x38   :  { %680 = vmatprep.subr.msk.bf16.mxu0 %vm820_vm1, %v678_v57 }
  0x3f   :  { %683 = vmatpush3.bf16.xpose.msk.msra.mxu0 %vm820_vm1, %v681_v60 }
  0x46   :  { %629 = vmatmul.mubr.msk.f32.vlgmr.msra.gmra.mrb[0].mxu0 %vm89_vm0, %v854_v18 }
  0x47   :  { %630 = vmatprep.mubr.msk.f32.mxu0 %vm89_vm0, %v30_v61 }
  0x4a   :  { %631 = vmatmul.mubr.msk.f32.gmra.mrb[2].mxu0 %vm89_vm0, %v30_v61 }
  0x4b   :  { %632 = vmatprep.mubr.msk.f32.mxu0 %vm89_vm0, %v31_v62 }
  0x4e   :  { %633 = vmatmul.mubr.msk.f32.gmra.mrb[4].mxu0 %vm89_vm0, %v31_v62 }
  0x4f   :  { %634 = vmatprep.mubr.msk.f32.mxu0 %vm89_vm0, %v32_v63 }
  0x52   :  { %635 = vmatmul.mubr.msk.f32.gmra.mrb[6].mxu0 %vm89_vm0, %v32_v63 }
  0x87   :  { %v72_v1 = vpop.permute.xlu0 %71 }
  0x88   :  { %v82_v10 = vpop.permute.xlu1 %81 }
  0x90   :  { %v77_v6 = vpop.permute.xlu0 %76  ;;  %v87_v16 = vpop.permute.xlu1 %86 }
  0x94   :  { %v306_v37 = vpop.permute.xlu0 %305  ;;  %v311_v42 = vpop.permute.xlu1 %310 }
  0x98   :  { %v316_v47 = vpop.permute.xlu0 %315  ;;  %v321_v52 = vpop.permute.xlu1 %320 }
 0x119   :  { %v264_v2 = vpop.f32.mrb[0].mxu0 }
 0x11a   :  { %v265_v3 = vadd.f32 %v264_v2, %v72_v1  ;;  %v266_v4 = vpop.f32.mrb[1].mxu0 }
 0x11b   :  { %v267_v5 = vadd.f32 %v266_v4, %v72_v1 }
 0x11c   :  { %706 = vtanh.f32 %v265_v3 }
 0x11d   :  { %v270_v7 = vpop.f32.mrb[2].mxu0  ;;  %708 = vtanh.f32 %v267_v5  ;;  %v433_v5 = vld [vmem:[%s1028_s5] sm:$0x1]  ;;  %s738_s5 = scalar_lea.vmem %s548_s21, 32 }
 0x11e   :  { %v271_v8 = vadd.f32 %v270_v7, %v77_v6  ;;  %v272_v9 = vpop.f32.mrb[3].mxu0  ;;  %p739_p0 = scmp.ne.s32.totalorder %s548_s21, %s738_s5  ;;  %p744_p2 = scmp.lt.s32.totalorder %s738_s5, %s738_s5 }
 0x11f   :  { %v273_v11 = vadd.f32 %v272_v9, %v77_v6  ;;  %v440_v6 = vlaneseq }
 0x120   :  { %710 = vtanh.f32 %v271_v8  ;;  %v764_v8 = vmov 1966171168   ;;  %p745_p3 = por %p744_p2, %p743_p1 }
 0x121   :  { %712 = vtanh.f32 %v273_v11  ;;  %v276_v12 = vpop.f32.mrb[4].mxu0  ;;  %v441_v7 = vshrl.u32 %v440_v6, 7  ;;  %v522_v9 = vunpack.c.l.s4 %v764_v8  ;;  %v438_v11 = vpop.permute.xlu0 %437  ;;  %vm538_vm3 = vcmp.lt.s32.totalorder %v440_v6, 256 }
 0x122   :  { %v277_v13 = vadd.f32 %v276_v12, %v82_v10  ;;  %v278_v14 = vpop.f32.mrb[5].mxu0  ;;  %p746_p4 = pnand %p745_p3, %p739_p0 }
 0x123   :  { %v279_v15 = vadd.f32 %v278_v14, %v82_v10  ;;  %v442_v10 = vsub.s32 0, %v441_v7  ;;  %v523_v12 = vunpack.c.0.s8 %v522_v9 }
 0x124   :  { %714 = vtanh.f32 %v277_v13 }
 0x125   :  { %v282_v17 = vpop.f32.mrb[6].mxu0  ;;  %716 = vtanh.f32 %v279_v15  ;;  %v443_v13 = vrot.slane %v438_v11, %v442_v10 }
 0x126   :  { %v283_v18 = vadd.f32 %v282_v17, %v87_v16  ;;  %v284_v19 = vpop.f32.mrb[7].mxu0  ;;  %v707_v21 = vpop.eup %706 }
 0x127   :  { %v285_v20 = vadd.f32 %v284_v19, %v87_v16  ;;  %v709_v22 = vpop.eup %708 }
 0x128   :  { %718 = vtanh.f32 %v283_v18  ;;  %v526_v18 = vsub.s32 %v523_v12, %v441_v7 }
 0x129   :  { %720 = vtanh.f32 %v285_v20 }
 0x12a   :  { %v711_v23 = vpop.eup %710 }
 0x12b   :  { %v713_v24 = vpop.eup %712  ;;  %v686_v25 = vpack.c.bf16 %v711_v23, %v707_v21 }
 0x12c   :  { %v684_v26 = vpack.c.bf16 %v713_v24, %v709_v22 }
 0x12e   :  { %685 = vmatprep.subr.bf16.mxu1 %v684_v26  ;;  %v715_v27 = vpop.eup %714 }
 0x12f   :  { %687 = vmatpush1.bf16.msra.mxu1 %v686_v25  ;;  %v717_v28 = vpop.eup %716 }
 0x132   :  { %v719_v29 = vpop.eup %718 }
 0x133   :  { %v721_v30 = vpop.eup %720  ;;  %v690_v31 = vpack.c.bf16 %v719_v29, %v715_v27 }
 0x134   :  { %v688_v32 = vpack.c.bf16 %v721_v30, %v717_v28 }
 0x136   :  { %689 = vmatprep.subr.bf16.mxu1 %v688_v32 }
 0x137   :  { %691 = vmatpush1.bf16.msra.mxu1 %v690_v31 }
 0x13a   :  { %591 = vmatmul.mubr.msk.f32.vlgmr.msra.gmra.mrb[0].mxu1 %vm323_vm2, %v295_v33 }
 0x13b   :  { %406 = vmatprep.mubr.f32.mxu1 %v763_v0 }
 0x13e   :  { %592 = vmatmul.mubr.msk.f32.gmra.mrb[2].mxu1 %vm323_vm2, %v296_v34 }
 0x13f   :  { %412 = vmatprep.mubr.f32.mxu1 %v763_v0 }
 0x142   :  { %593 = vmatmul.mubr.msk.f32.gmra.mrb[4].mxu1 %vm323_vm2, %v297_v35 }
 0x143   :  { %418 = vmatprep.mubr.f32.mxu1 %v763_v0 }
 0x146   :  { %594 = vmatmul.mubr.msk.f32.gmra.mrb[6].mxu1 %vm323_vm2, %v298_v36 }
 0x147   :  { %511 = vmatprep.mubr.f32.mxu1 %v763_v0 }
 0x20d   :  { %v402_v38 = vpop.f32.mrb[0].mxu1 }
 0x20e   :  { %v403_v39 = vadd.f32 %v402_v38, %v306_v37  ;;  %v404_v40 = vpop.f32.mrb[1].mxu1 }
 0x20f   :  { %v405_v41 = vadd.f32 %v404_v40, %v306_v37 }
 0x210   :  { %722 = vtanh.f32 %v403_v39 }
 0x211   :  { %v408_v43 = vpop.f32.mrb[2].mxu1  ;;  %724 = vtanh.f32 %v405_v41 }
 0x212   :  { %v409_v44 = vadd.f32 %v408_v43, %v311_v42  ;;  %v410_v45 = vpop.f32.mrb[3].mxu1 }
 0x213   :  { %v411_v46 = vadd.f32 %v410_v45, %v311_v42 }
 0x214   :  { %726 = vtanh.f32 %v409_v44 }
 0x215   :  { %728 = vtanh.f32 %v411_v46  ;;  %v414_v48 = vpop.f32.mrb[4].mxu1 }
 0x216   :  { %v415_v49 = vadd.f32 %v414_v48, %v316_v47  ;;  %v416_v50 = vpop.f32.mrb[5].mxu1 }
 0x217   :  { %v417_v51 = vadd.f32 %v416_v50, %v316_v47 }
 0x218   :  { %730 = vtanh.f32 %v415_v49 }
 0x219   :  { %v420_v53 = vpop.f32.mrb[6].mxu1  ;;  %732 = vtanh.f32 %v417_v51 }
 0x21a   :  { %v421_v54 = vadd.f32 %v420_v53, %v321_v52  ;;  %v422_v55 = vpop.f32.mrb[7].mxu1  ;;  %v723_v57 = vpop.eup %722 }
 0x21b   :  { %v423_v56 = vadd.f32 %v422_v55, %v321_v52  ;;  %v725_v58 = vpop.eup %724 }
 0x21c   :  { %734 = vtanh.f32 %v421_v54 }
 0x21d   :  { %736 = vtanh.f32 %v423_v56 }
 0x21e   :  { %v727_v59 = vpop.eup %726 }
 0x21f   :  { %v729_v60 = vpop.eup %728  ;;  %v694_v61 = vpack.c.bf16 %v727_v59, %v723_v57 }
 0x220   :  { %v692_v62 = vpack.c.bf16 %v729_v60, %v725_v58 }
 0x222   :  { %693 = vmatprep.subr.bf16.mxu1 %v692_v62  ;;  %v731_v63 = vpop.eup %730 }
 0x223   :  { %695 = vmatpush1.bf16.msra.mxu1 %v694_v61  ;;  %v733_v0 = vpop.eup %732 }
 0x226   :  { %v735_v1 = vpop.eup %734 }
 0x227   :  { %v737_v2 = vpop.eup %736  ;;  %v698_v3 = vpack.c.bf16 %v735_v1, %v731_v63 }
 0x228   :  { %v696_v4 = vpack.c.bf16 %v737_v2, %v733_v0 }
 0x22a   :  { %697 = vmatprep.subr.bf16.mxu1 %v696_v4 }
 0x22b   :  { %699 = vmatpush1.bf16.msra.mxu1 %v698_v3 }
 0x22e   :  { %595 = vmatmul.mubr.msk.f32.vlgmr.msra.gmra.mrb[8].mxu1 %vm323_vm2, %v433_v5 }
 0x301   :  { %v513_v14 = vpop.f32.mrb[8].mxu1 }
 0x302   :  { %v514_v15 = vadd.f32 %v513_v14, %v443_v13  ;;  %v515_v16 = vpop.f32.mrb[9].mxu1 }
 0x303   :  { %v516_v17 = vadd.f32 %v515_v16, %v443_v13 }
 0x305   :  { %v520_v19 = vcombine.low %v514_v15, %v516_v17 }
 0x307   :  { %v527_v20 = vrot.slane %v520_v19, %v526_v18 }
 0x309   :  { %v534_v21 = vrot.slane %v527_v20, %v526_v18 }
 0x30b   :  { %540 = vst.msk [vmem:[#allocation3] sm:$0x3] %vm538_vm3, %v534_v21 }
 0x30c   :  { %749 = shalt.err (!%p746_p4)
}
 0x30d   :  { %s750_s24 = scalar_lea.hbm %s1030_s7, 32 }
 0x30e   :  { %p751_p5 = scmp.ne.s32.totalorder %s1030_s7, %s750_s24  ;;  %p754_p6 = scmp.lt.u32.totalorder %s750_s24, %s1030_s7 }
 0x310   :  { %p756_p7 = pnand %p754_p6, %p751_p5 }
 0x312   :  { %759 = shalt.err (!%p756_p7)
}
 0x313   :  { %550 = dma.vmem_to_hbm [thread:$0]  %s548_s21, 32, %s1030_s7, [#allocation4]  }
 0x314   :  { %760 = dma.done.wait [#allocation4], 32  }
 0x315   :  { %761 = vsyncadd [#allocation4], 4294967264 }
 0x316   :  { %554 = vsyncpa [#allocation4], 1 }

</bundles_post_ra>
